<compile_context>
chip_gen: v5e
topology: v5e:2x2
jax: 0.10.0
libtpu: 0.0.40
codegen_flags: <defaults>
</compile_context>

<pallas_src>
import functools

import jax
import jax.numpy as jnp
from jax.experimental import pallas as pl
from jax.experimental.pallas import tpu as pltpu


# ---------------------------------------------------------------------------
# Pallas kernel: TB batch examples per grid step.
# ---------------------------------------------------------------------------
def memnn_kernel(ids_ref, a_all_ref, gsum_ref, beta_ref, ta_ref, tc_ref,
                 mask_ref, proj_ref, b_ref, out_ref, *, hops, embd, tb, story_len):
    f32 = jnp.float32
    E = embd
    S = story_len
    HE = hops * E
    N = ids_ref.shape[0]                 # TB * (story tokens + question tokens)
    Vp = a_all_ref.shape[0]              # vocab padded to a 128-lane multiple
    ts = tb * S

    # one-hot token encoding (padding id 0 selects the zeroed embedding row)
    ids = ids_ref[...]                                               # (N, 1) i32
    oh = (jax.lax.broadcasted_iota(jnp.int32, (N, Vp), 1) == ids).astype(f32)

    # --- ONE fused embedding matmul for all hop tables, all TB examples
    emb = jnp.dot(oh, a_all_ref[...], preferred_element_type=f32)    # (N, (hops+1)*E)

    # --- ONE block-diagonal group-sum contraction:
    #   rows [0, ts)          unweighted per-sentence sums      -> c path
    #   rows [ts, ts+tb)      per-example question sums         -> u
    #   rows [ts+tb, 2ts+tb)  alpha-weighted per-sentence sums  -> m path (rank-2 pe)
    #   rows [2ts+tb, 3ts+tb) gamma-weighted per-sentence sums  -> m path (rank-2 pe)
    red = jnp.dot(gsum_ref[...], emb, preferred_element_type=f32)    # (3*ts+tb, (hops+1)*E)

    c_all = red[:ts, E:] + tc_ref[...]                               # (TB*S, hops*E)
    u = red[ts:ts + tb, :E]                                          # (TB, E)
    m_all = (red[ts + tb:2 * ts + tb, :HE]
             + beta_ref[...] * red[2 * ts + tb:3 * ts + tb, :HE]
             + ta_ref[...])                                          # (TB*S, hops*E)

    mask = mask_ref[...]                                             # (TB, TB*S) additive

    # --- memory hops (hops static; whole-block attention stays on the MXU)
    # TODO(synk): the k*E lane-offset hop-chunk slices are filler at E=16; if E or
    #             hops grow, reorder so the hop axis lands on sublanes.
    for k in range(hops):
        m_k = m_all[:, k * E:(k + 1) * E]                            # (TB*S, E)
        c_k = c_all[:, k * E:(k + 1) * E]                            # (TB*S, E)
        logits = jax.lax.dot_general(u, m_k, (((1,), (1,)), ((), ())),
                                     preferred_element_type=f32) + mask   # (TB, TB*S)
        p = jnp.exp(logits - jnp.max(logits, axis=-1, keepdims=True))
        p = p * pl.reciprocal(jnp.sum(p, axis=-1, keepdims=True), approx=True)
        o = jnp.dot(p, c_k, preferred_element_type=f32)              # (TB, E)
        u = o + u

    # --- precomposed output head (128-lane padded, unmasked dense store)
    final = jnp.dot(u, proj_ref[...], preferred_element_type=f32) + b_ref[...]
    out_ref[...] = final.astype(out_ref.dtype)


def _const_spec(shape):
    """Grid-invariant operand: constant index map, single-buffered if supported."""
    idx = lambda i: (0,) * len(shape)
    try:
        return pl.BlockSpec(shape, idx, pipeline_mode=pl.Buffered(1))
    except (TypeError, AttributeError):
        return pl.BlockSpec(shape, idx)


# ---------------------------------------------------------------------------
# Wrapper: constant-operand setup (XLA const-folds) + pallas_call
# ---------------------------------------------------------------------------
def memnn_forward(x, q, A_stack, TA, TC, lin_w, lin_b, *, hops, batch_block=8):
    bs, story_len, sent_len = x.shape
    q_len = q.shape[1]
    hp1, vocab, embd = A_stack.shape
    assert hp1 == hops + 1
    ans = lin_w.shape[0]
    f32 = jnp.float32

    LANE = 128
    TB = batch_block
    assert TB % 8 == 0, "batch block must be a multiple of 8 (sublane alignment)"
    bs_pad = ((bs + TB - 1) // TB) * TB
    nb = bs_pad // TB

    S, J, E = story_len, sent_len, embd
    n_tok = S * J
    R = n_tok + q_len
    N = TB * R
    HE = hops * E
    HE1 = (hops + 1) * E
    Vp = ((vocab + LANE - 1) // LANE) * LANE
    ANSp = ((ans + LANE - 1) // LANE) * LANE

    # fused embedding table, vocab padded to 128 lanes: A_all[:, k*E:(k+1)*E] == A[k]
    a_all = jnp.transpose(A_stack, (1, 0, 2)).reshape(vocab, HE1)
    a_all = jnp.pad(a_all, ((0, Vp - vocab), (0, 0))).astype(f32)    # (Vp, (hops+1)*E)

    # rank-2 position encoding: pe[j,k] = alpha_j + beta_k * gamma_j
    jj = jnp.arange(1, J + 1, dtype=f32)
    alpha = 1.0 - jj / J
    gamma = 2.0 * jj / J - 1.0
    beta = jnp.tile(jnp.arange(1, E + 1, dtype=f32) / E, hops)[None, :]   # (1, hops*E)

    # block-diagonal group-sum matrix for the TB examples of a grid step
    eye_ts = jnp.eye(TB * S, dtype=f32)
    eye_tb = jnp.eye(TB, dtype=f32)
    z_q = jnp.zeros((TB * S, TB * q_len), f32)
    sent_unw = jnp.concatenate([jnp.kron(eye_ts, jnp.ones((1, J), f32)), z_q], axis=1)
    sent_a = jnp.concatenate([jnp.kron(eye_ts, alpha[None, :]), z_q], axis=1)
    sent_g = jnp.concatenate([jnp.kron(eye_ts, gamma[None, :]), z_q], axis=1)
    q_rows = jnp.concatenate(
        [jnp.zeros((TB, TB * n_tok), f32),
         jnp.kron(eye_tb, jnp.ones((1, q_len), f32))], axis=1)
    gsum = jnp.concatenate([sent_unw, q_rows, sent_a, sent_g], axis=0)    # (3*TB*S+TB, N)

    # temporal encodings tiled across hop chunks and the batch block
    ta_rep = jnp.tile(jnp.tile(TA[:S], (1, hops)), (TB, 1)).astype(f32)   # (TB*S, hops*E)
    tc_rep = jnp.tile(jnp.tile(TC[:S], (1, hops)), (TB, 1)).astype(f32)

    # additive block-diagonal attention mask: 0 in-example, -1e30 cross-example
    blk = jnp.kron(eye_tb, jnp.ones((1, S), f32))
    attn_mask = (blk - 1.0) * 1e30                                        # (TB, TB*S)

    # precomposed output head, padded to a 128-lane-dense store
    proj = (lin_w @ A_stack[hops]).T                                      # (E, ans)
    proj = jnp.pad(proj, ((0, 0), (0, ANSp - ans))).astype(f32)
    bias = jnp.pad(lin_b.reshape(1, ans), ((0, 0), (0, ANSp - ans))).astype(f32)

    # per-block token ids: story tokens (example-major) then question tokens
    xp = jnp.pad(x, ((0, bs_pad - bs), (0, 0), (0, 0))).reshape(bs_pad, n_tok)
    qp = jnp.pad(q, ((0, bs_pad - bs), (0, 0)))
    ids = jnp.concatenate(
        [xp.reshape(nb, TB * n_tok), qp.reshape(nb, TB * q_len)], axis=1)
    ids = ids.reshape(nb * N, 1).astype(jnp.int32)

    kernel = functools.partial(memnn_kernel, hops=hops, embd=E, tb=TB, story_len=S)

    out = pl.pallas_call(
        kernel,
        out_shape=jax.ShapeDtypeStruct((bs_pad, ANSp), jnp.float32),
        grid=(nb,),
        in_specs=[
            pl.BlockSpec((N, 1), lambda i: (i, 0)),        # per-block token ids
            _const_spec((Vp, HE1)),                        # fused A tables (resident)
            _const_spec((3 * TB * S + TB, N)),             # block-diag group-sum matrix
            _const_spec((1, HE)),                          # pe beta column scale
            _const_spec((TB * S, HE)),                     # TA tiled
            _const_spec((TB * S, HE)),                     # TC tiled
            _const_spec((TB, TB * S)),                     # attention block mask
            _const_spec((E, ANSp)),                        # precomposed head
            _const_spec((1, ANSp)),                        # bias (padded)
        ],
        out_specs=pl.BlockSpec((TB, ANSp), lambda i: (i, 0)),
        compiler_params=pltpu.CompilerParams(
            dimension_semantics=("parallel",),
            vmem_limit_bytes=32 * 1024 * 1024),
    )(ids, a_all, gsum, beta, ta_rep, tc_rep, attn_mask, proj, bias)

    return out[:bs, :ans]


# ---------------------------------------------------------------------------
# Pure-JAX reference (mirrors the PyTorch forward, dropout = identity)
# ---------------------------------------------------------------------------
def memnn_reference(x, q, A_stack, TA, TC, lin_w, lin_b, *, hops):
    bs, story_len, sent_len = x.shape
    embd = A_stack.shape[2]
    j = jnp.arange(1, sent_len + 1, dtype=jnp.float32)[:, None]
    kk = jnp.arange(1, embd + 1, dtype=jnp.float32)[None, :]
    pe = 1.0 - j / sent_len - (kk / embd) * (1.0 - 2.0 * j / sent_len)
    pe = pe.astype(jnp.float16).astype(jnp.float32)                  # half-precision pe

    u = jnp.sum(A_stack[0][q], axis=1)                               # (bs, E)
    for k in range(hops):
        m = A_stack[k][x] * pe[None, None]                           # (bs,S,J,E)
        m = jnp.sum(m, axis=2) + TA[None, :story_len]
        c = jnp.sum(A_stack[k + 1][x], axis=2) + TC[None, :story_len]
        p = jax.nn.softmax(jnp.einsum("bse,be->bs", m, u), axis=-1)
        o = jnp.einsum("bs,bse->be", p, c)
        u = o + u
    out = u @ A_stack[hops].T                                        # (bs, V)
    return out @ lin_w.T + lin_b[None, :]


# ---------------------------------------------------------------------------
if __name__ == "__main__":
    # small, forward-consistent shapes (bs=16 so the batch-blocked grid has 2 steps)
    vocab_size, embd_size, ans_size = 32, 16, 8
    max_story_len, story_len, sent_len = 6, 4, 8
    hops, bs, q_len = 3, 16, 6

    key = jax.random.PRNGKey(0)
    k_a, k_ta, k_tc, k_w, k_b, k_x, k_q = jax.random.split(key, 7)

    # embeddings A[0..hops], normal(0, 0.1), row 0 zeroed (padding)
    A_stack = 0.1 * jax.random.normal(
        k_a, (hops + 1, vocab_size, embd_size), dtype=jnp.float32)
    A_stack = A_stack.at[:, 0, :].set(0.0)

    # temporal encodings
    TA = 0.1 * jax.random.normal(k_ta, (max_story_len, embd_size), jnp.float32)
    TC = 0.1 * jax.random.normal(k_tc, (max_story_len, embd_size), jnp.float32)

    # final linear (PyTorch-default-style uniform init, deterministic)
    bound = 1.0 / (vocab_size ** 0.5)
    lin_w = jax.random.uniform(k_w, (ans_size, vocab_size), jnp.float32, -bound, bound)
    lin_b = jax.random.uniform(k_b, (ans_size,), jnp.float32, -bound, bound)

    # integer inputs (0 acts as padding id -> zero embedding row)
    x = jax.random.randint(k_x, (bs, story_len, sent_len), 0, vocab_size, dtype=jnp.int32)
    q = jax.random.randint(k_q, (bs, q_len), 0, vocab_size, dtype=jnp.int32)

    out = memnn_forward(x, q, A_stack, TA, TC, lin_w, lin_b, hops=hops)
    out = jax.block_until_ready(out)

    ref = memnn_reference(x, q, A_stack, TA, TC, lin_w, lin_b, hops=hops)
    assert out.shape == (bs, ans_size)
    # tolerance 2e-3: the only intentional deviation is the EUP approx reciprocal
    # in the softmax normalization; everything else is exact f32 reassociation.
    assert jnp.allclose(out, ref, rtol=2e-3, atol=2e-3), (out, ref)

    print("KERNEL_OK")
</pallas_src>

<mosaic_0001>
module attributes {stable_mosaic.version = 11 : i64} {
  func.func @memnn_kernel(%arg0: i32, %arg1: memref<304x1xi32, #tpu.memory_space<vmem>>, %arg2: memref<128x64xf32, #tpu.memory_space<vmem>>, %arg3: memref<104x304xf32, #tpu.memory_space<vmem>>, %arg4: memref<1x48xf32, #tpu.memory_space<vmem>>, %arg5: memref<32x48xf32, #tpu.memory_space<vmem>>, %arg6: memref<32x48xf32, #tpu.memory_space<vmem>>, %arg7: memref<8x32xf32, #tpu.memory_space<vmem>>, %arg8: memref<16x128xf32, #tpu.memory_space<vmem>>, %arg9: memref<1x128xf32, #tpu.memory_space<vmem>>, %arg10: memref<8x128xf32, #tpu.memory_space<vmem>>) attributes {dimension_semantics = [#tpu.dimension_semantics<parallel>], iteration_bounds = array<i64: 2>, scalar_prefetch = 0 : i64, scratch_operands = 0 : i64, tpu.core_type = #tpu.core_type<tc>, window_params = [{transform_indices = @transform_0, window_bounds = array<i64: 304, 1>}, {pipeline_mode = #tpu.pipeline_mode<synchronous>, transform_indices = @transform_1, window_bounds = array<i64: 128, 64>}, {pipeline_mode = #tpu.pipeline_mode<synchronous>, transform_indices = @transform_2, window_bounds = array<i64: 104, 304>}, {pipeline_mode = #tpu.pipeline_mode<synchronous>, transform_indices = @transform_3, window_bounds = array<i64: 1, 48>}, {pipeline_mode = #tpu.pipeline_mode<synchronous>, transform_indices = @transform_4, window_bounds = array<i64: 32, 48>}, {pipeline_mode = #tpu.pipeline_mode<synchronous>, transform_indices = @transform_5, window_bounds = array<i64: 32, 48>}, {pipeline_mode = #tpu.pipeline_mode<synchronous>, transform_indices = @transform_6, window_bounds = array<i64: 8, 32>}, {pipeline_mode = #tpu.pipeline_mode<synchronous>, transform_indices = @transform_7, window_bounds = array<i64: 16, 128>}, {pipeline_mode = #tpu.pipeline_mode<synchronous>, transform_indices = @transform_8, window_bounds = array<i64: 1, 128>}, {transform_indices = @transform_9, window_bounds = array<i64: 8, 128>}]} {
    %c0 = arith.constant 0 : index
    %c0_0 = arith.constant 0 : index
    %0 = vector.load %arg1[%c0, %c0_0] : memref<304x1xi32, #tpu.memory_space<vmem>>, vector<304x1xi32>
    %1 = tpu.iota {dimensions = array<i32: 1>} : vector<304x128xi32>
    %2 = vector.broadcast %0 : vector<304x1xi32> to vector<304x128xi32>
    %3 = arith.cmpi eq, %1, %2 : vector<304x128xi32>
    %4 = arith.extui %3 : vector<304x128xi1> to vector<304x128xi32>
    %5 = arith.sitofp %4 : vector<304x128xi32> to vector<304x128xf32>
    %c0_1 = arith.constant 0 : index
    %c0_2 = arith.constant 0 : index
    %6 = vector.load %arg2[%c0_1, %c0_2] : memref<128x64xf32, #tpu.memory_space<vmem>>, vector<128x64xf32>
    %cst = arith.constant dense<0.000000e+00> : vector<304x64xf32>
    %7 = tpu.matmul %5, %6, %cst {dimension_numbers = #tpu.dot_dimension_numbers<[1], [0], [0], [1], [0, 0, 1, 1], [], []>} : vector<304x128xf32>, vector<128x64xf32>, vector<304x64xf32> -> vector<304x64xf32>
    %c0_3 = arith.constant 0 : index
    %c0_4 = arith.constant 0 : index
    %8 = vector.load %arg3[%c0_3, %c0_4] : memref<104x304xf32, #tpu.memory_space<vmem>>, vector<104x304xf32>
    %cst_5 = arith.constant dense<0.000000e+00> : vector<104x64xf32>
    %9 = tpu.matmul %8, %7, %cst_5 {dimension_numbers = #tpu.dot_dimension_numbers<[1], [0], [0], [1], [0, 0, 1, 1], [], []>} : vector<104x304xf32>, vector<304x64xf32>, vector<104x64xf32> -> vector<104x64xf32>
    %10 = vector.extract_strided_slice %9 {offsets = [0, 16], sizes = [32, 48], strides = [1, 1]} : vector<104x64xf32> to vector<32x48xf32>
    %c0_6 = arith.constant 0 : index
    %c0_7 = arith.constant 0 : index
    %11 = vector.load %arg6[%c0_6, %c0_7] : memref<32x48xf32, #tpu.memory_space<vmem>>, vector<32x48xf32>
    %12 = arith.addf %10, %11 : vector<32x48xf32>
    %13 = vector.extract_strided_slice %9 {offsets = [32, 0], sizes = [8, 16], strides = [1, 1]} : vector<104x64xf32> to vector<8x16xf32>
    %14 = vector.extract_strided_slice %9 {offsets = [40, 0], sizes = [32, 48], strides = [1, 1]} : vector<104x64xf32> to vector<32x48xf32>
    %c0_8 = arith.constant 0 : index
    %c0_9 = arith.constant 0 : index
    %15 = vector.load %arg4[%c0_8, %c0_9] : memref<1x48xf32, #tpu.memory_space<vmem>>, vector<1x48xf32>
    %16 = vector.extract_strided_slice %9 {offsets = [72, 0], sizes = [32, 48], strides = [1, 1]} : vector<104x64xf32> to vector<32x48xf32>
    %17 = vector.broadcast %15 : vector<1x48xf32> to vector<32x48xf32>
    %18 = arith.mulf %17, %16 : vector<32x48xf32>
    %19 = arith.addf %14, %18 : vector<32x48xf32>
    %c0_10 = arith.constant 0 : index
    %c0_11 = arith.constant 0 : index
    %20 = vector.load %arg5[%c0_10, %c0_11] : memref<32x48xf32, #tpu.memory_space<vmem>>, vector<32x48xf32>
    %21 = arith.addf %19, %20 : vector<32x48xf32>
    %c0_12 = arith.constant 0 : index
    %c0_13 = arith.constant 0 : index
    %22 = vector.load %arg7[%c0_12, %c0_13] : memref<8x32xf32, #tpu.memory_space<vmem>>, vector<8x32xf32>
    %23 = vector.extract_strided_slice %21 {offsets = [0, 0], sizes = [32, 16], strides = [1, 1]} : vector<32x48xf32> to vector<32x16xf32>
    %24 = vector.extract_strided_slice %12 {offsets = [0, 0], sizes = [32, 16], strides = [1, 1]} : vector<32x48xf32> to vector<32x16xf32>
    %cst_14 = arith.constant dense<0.000000e+00> : vector<8x32xf32>
    %25 = tpu.matmul %13, %23, %cst_14 {dimension_numbers = #tpu.dot_dimension_numbers<[1], [1], [0], [0], [0, 0, 1, 0], [], []>} : vector<8x16xf32>, vector<32x16xf32>, vector<8x32xf32> -> vector<8x32xf32>
    %26 = arith.addf %25, %22 : vector<8x32xf32>
    %cst_15 = arith.constant dense<0xFF800000> : vector<8xf32>
    %27 = vector.multi_reduction <maximumf>, %26, %cst_15 [1] : vector<8x32xf32> to vector<8xf32>
    %28 = vector.shape_cast %27 : vector<8xf32> to vector<8x1xf32>
    %29 = vector.broadcast %28 : vector<8x1xf32> to vector<8x32xf32>
    %30 = arith.subf %26, %29 : vector<8x32xf32>
    %31 = math.exp %30 : vector<8x32xf32>
    %cst_16 = arith.constant dense<0.000000e+00> : vector<8xf32>
    %32 = vector.multi_reduction <add>, %31, %cst_16 [1] : vector<8x32xf32> to vector<8xf32>
    %33 = vector.shape_cast %32 : vector<8xf32> to vector<8x1xf32>
    %34 = tpu.reciprocal %33 {approx = true} : vector<8x1xf32> -> vector<8x1xf32>
    %35 = vector.broadcast %34 : vector<8x1xf32> to vector<8x32xf32>
    %36 = arith.mulf %31, %35 : vector<8x32xf32>
    %cst_17 = arith.constant dense<0.000000e+00> : vector<8x16xf32>
    %37 = tpu.matmul %36, %24, %cst_17 {dimension_numbers = #tpu.dot_dimension_numbers<[1], [0], [0], [1], [0, 0, 1, 1], [], []>} : vector<8x32xf32>, vector<32x16xf32>, vector<8x16xf32> -> vector<8x16xf32>
    %38 = arith.addf %37, %13 : vector<8x16xf32>
    %39 = vector.extract_strided_slice %21 {offsets = [0, 16], sizes = [32, 16], strides = [1, 1]} : vector<32x48xf32> to vector<32x16xf32>
    %40 = vector.extract_strided_slice %12 {offsets = [0, 16], sizes = [32, 16], strides = [1, 1]} : vector<32x48xf32> to vector<32x16xf32>
    %cst_18 = arith.constant dense<0.000000e+00> : vector<8x32xf32>
    %41 = tpu.matmul %38, %39, %cst_18 {dimension_numbers = #tpu.dot_dimension_numbers<[1], [1], [0], [0], [0, 0, 1, 0], [], []>} : vector<8x16xf32>, vector<32x16xf32>, vector<8x32xf32> -> vector<8x32xf32>
    %42 = arith.addf %41, %22 : vector<8x32xf32>
    %cst_19 = arith.constant dense<0xFF800000> : vector<8xf32>
    %43 = vector.multi_reduction <maximumf>, %42, %cst_19 [1] : vector<8x32xf32> to vector<8xf32>
    %44 = vector.shape_cast %43 : vector<8xf32> to vector<8x1xf32>
    %45 = vector.broadcast %44 : vector<8x1xf32> to vector<8x32xf32>
    %46 = arith.subf %42, %45 : vector<8x32xf32>
    %47 = math.exp %46 : vector<8x32xf32>
    %cst_20 = arith.constant dense<0.000000e+00> : vector<8xf32>
    %48 = vector.multi_reduction <add>, %47, %cst_20 [1] : vector<8x32xf32> to vector<8xf32>
    %49 = vector.shape_cast %48 : vector<8xf32> to vector<8x1xf32>
    %50 = tpu.reciprocal %49 {approx = true} : vector<8x1xf32> -> vector<8x1xf32>
    %51 = vector.broadcast %50 : vector<8x1xf32> to vector<8x32xf32>
    %52 = arith.mulf %47, %51 : vector<8x32xf32>
    %cst_21 = arith.constant dense<0.000000e+00> : vector<8x16xf32>
    %53 = tpu.matmul %52, %40, %cst_21 {dimension_numbers = #tpu.dot_dimension_numbers<[1], [0], [0], [1], [0, 0, 1, 1], [], []>} : vector<8x32xf32>, vector<32x16xf32>, vector<8x16xf32> -> vector<8x16xf32>
    %54 = arith.addf %53, %38 : vector<8x16xf32>
    %55 = vector.extract_strided_slice %21 {offsets = [0, 32], sizes = [32, 16], strides = [1, 1]} : vector<32x48xf32> to vector<32x16xf32>
    %56 = vector.extract_strided_slice %12 {offsets = [0, 32], sizes = [32, 16], strides = [1, 1]} : vector<32x48xf32> to vector<32x16xf32>
    %cst_22 = arith.constant dense<0.000000e+00> : vector<8x32xf32>
    %57 = tpu.matmul %54, %55, %cst_22 {dimension_numbers = #tpu.dot_dimension_numbers<[1], [1], [0], [0], [0, 0, 1, 0], [], []>} : vector<8x16xf32>, vector<32x16xf32>, vector<8x32xf32> -> vector<8x32xf32>
    %58 = arith.addf %57, %22 : vector<8x32xf32>
    %cst_23 = arith.constant dense<0xFF800000> : vector<8xf32>
    %59 = vector.multi_reduction <maximumf>, %58, %cst_23 [1] : vector<8x32xf32> to vector<8xf32>
    %60 = vector.shape_cast %59 : vector<8xf32> to vector<8x1xf32>
    %61 = vector.broadcast %60 : vector<8x1xf32> to vector<8x32xf32>
    %62 = arith.subf %58, %61 : vector<8x32xf32>
    %63 = math.exp %62 : vector<8x32xf32>
    %cst_24 = arith.constant dense<0.000000e+00> : vector<8xf32>
    %64 = vector.multi_reduction <add>, %63, %cst_24 [1] : vector<8x32xf32> to vector<8xf32>
    %65 = vector.shape_cast %64 : vector<8xf32> to vector<8x1xf32>
    %66 = tpu.reciprocal %65 {approx = true} : vector<8x1xf32> -> vector<8x1xf32>
    %67 = vector.broadcast %66 : vector<8x1xf32> to vector<8x32xf32>
    %68 = arith.mulf %63, %67 : vector<8x32xf32>
    %cst_25 = arith.constant dense<0.000000e+00> : vector<8x16xf32>
    %69 = tpu.matmul %68, %56, %cst_25 {dimension_numbers = #tpu.dot_dimension_numbers<[1], [0], [0], [1], [0, 0, 1, 1], [], []>} : vector<8x32xf32>, vector<32x16xf32>, vector<8x16xf32> -> vector<8x16xf32>
    %70 = arith.addf %69, %54 : vector<8x16xf32>
    %c0_26 = arith.constant 0 : index
    %c0_27 = arith.constant 0 : index
    %71 = vector.load %arg8[%c0_26, %c0_27] : memref<16x128xf32, #tpu.memory_space<vmem>>, vector<16x128xf32>
    %cst_28 = arith.constant dense<0.000000e+00> : vector<8x128xf32>
    %72 = tpu.matmul %70, %71, %cst_28 {dimension_numbers = #tpu.dot_dimension_numbers<[1], [0], [0], [1], [0, 0, 1, 1], [], []>} : vector<8x16xf32>, vector<16x128xf32>, vector<8x128xf32> -> vector<8x128xf32>
    %c0_29 = arith.constant 0 : index
    %c0_30 = arith.constant 0 : index
    %73 = vector.load %arg9[%c0_29, %c0_30] : memref<1x128xf32, #tpu.memory_space<vmem>>, vector<1x128xf32>
    %74 = vector.broadcast %73 : vector<1x128xf32> to vector<8x128xf32>
    %75 = arith.addf %72, %74 : vector<8x128xf32>
    %c0_31 = arith.constant 0 : index
    %c0_32 = arith.constant 0 : index
    %76 = vector.load %arg10[%c0_31, %c0_32] : memref<8x128xf32, #tpu.memory_space<vmem>>, vector<8x128xf32>
    tpu.vector_store %arg10[%c0_31, %c0_32], %75 {strides = array<i32>} : memref<8x128xf32, #tpu.memory_space<vmem>>, vector<8x128xf32>,
    return
  }
  func.func @transform_0(%arg0: i32) -> (i32, i32) {
    %c0_i32 = arith.constant 0 : i32
    %c0_i32_0 = arith.constant 0 : i32
    return %arg0, %c0_i32 : i32, i32
  }
  func.func @transform_1(%arg0: i32) -> (i32, i32) {
    %c0_i32 = arith.constant 0 : i32
    %c0_i32_0 = arith.constant 0 : i32
    %c0_i32_1 = arith.constant 0 : i32
    return %c0_i32, %c0_i32_0 : i32, i32
  }
  func.func @transform_2(%arg0: i32) -> (i32, i32) {
    %c0_i32 = arith.constant 0 : i32
    %c0_i32_0 = arith.constant 0 : i32
    %c0_i32_1 = arith.constant 0 : i32
    return %c0_i32, %c0_i32_0 : i32, i32
  }
  func.func @transform_3(%arg0: i32) -> (i32, i32) {
    %c0_i32 = arith.constant 0 : i32
    %c0_i32_0 = arith.constant 0 : i32
    %c0_i32_1 = arith.constant 0 : i32
    return %c0_i32, %c0_i32_0 : i32, i32
  }
  func.func @transform_4(%arg0: i32) -> (i32, i32) {
    %c0_i32 = arith.constant 0 : i32
    %c0_i32_0 = arith.constant 0 : i32
    %c0_i32_1 = arith.constant 0 : i32
    return %c0_i32, %c0_i32_0 : i32, i32
  }
  func.func @transform_5(%arg0: i32) -> (i32, i32) {
    %c0_i32 = arith.constant 0 : i32
    %c0_i32_0 = arith.constant 0 : i32
    %c0_i32_1 = arith.constant 0 : i32
    return %c0_i32, %c0_i32_0 : i32, i32
  }
  func.func @transform_6(%arg0: i32) -> (i32, i32) {
    %c0_i32 = arith.constant 0 : i32
    %c0_i32_0 = arith.constant 0 : i32
    %c0_i32_1 = arith.constant 0 : i32
    return %c0_i32, %c0_i32_0 : i32, i32
  }
  func.func @transform_7(%arg0: i32) -> (i32, i32) {
    %c0_i32 = arith.constant 0 : i32
    %c0_i32_0 = arith.constant 0 : i32
    %c0_i32_1 = arith.constant 0 : i32
    return %c0_i32, %c0_i32_0 : i32, i32
  }
  func.func @transform_8(%arg0: i32) -> (i32, i32) {
    %c0_i32 = arith.constant 0 : i32
    %c0_i32_0 = arith.constant 0 : i32
    %c0_i32_1 = arith.constant 0 : i32
    return %c0_i32, %c0_i32_0 : i32, i32
  }
  func.func @transform_9(%arg0: i32) -> (i32, i32) {
    %c0_i32 = arith.constant 0 : i32
    %c0_i32_0 = arith.constant 0 : i32
    return %arg0, %c0_i32 : i32, i32
  }
}

</mosaic_0001>

<bundles_post_ra>
// kernel: tpu_custom_call.1
= control target key start
LH: loop header
LB: loop body
LE: loop exit
PB: predicated region body
PF: predicated region fallthrough
CT: control target
= control target key end

     0   :  { %s2298_s0 = inlined_call_operand.vmem [shape: s32[608,1], index: 0, kind: input, shape index: {}]   ;;  %s2299_s1 = inlined_call_operand.vmem [shape: f32[128,64], index: 1, kind: input, shape index: {}]   ;;  %s2300_s2 = inlined_call_operand.vmem [shape: f32[104,304], index: 2, kind: input, shape index: {}]   ;;  %s2301_s3 = inlined_call_operand.vmem [shape: f32[1,48], index: 3, kind: input, shape index: {}]   ;;  %s2302_s4 = inlined_call_operand.vmem [shape: f32[32,48], index: 4, kind: input, shape index: {}]   ;;  %s2303_s5 = inlined_call_operand.vmem [shape: f32[32,48], index: 5, kind: input, shape index: {}]   ;;  %s2304_s6 = inlined_call_operand.vmem [shape: f32[8,32], index: 6, kind: input, shape index: {}]   ;;  %s2305_s7 = inlined_call_operand.vmem [shape: f32[16,128], index: 7, kind: input, shape index: {}]   ;;  %s2306_s8 = inlined_call_operand.vmem [shape: f32[1,128], index: 8, kind: input, shape index: {}]   ;;  %s2307_s9 = inlined_call_operand.hbm [shape: f32[16,128], index: 9, kind: output, shape index: {}]  }
   0x1   :  { %2308 = sst [smem:[#allocation5_spill]] %s2298_s0 }
   0x2   :  { %14 = vsyncpa [#allocation3], 0 }
   0x3   :  { %16 = vsyncpa [#allocation3 + $0x1], 0  ;;  %s1780_s30 = smov 0   ;;  %s1782_s10 = smov 0  }
   0x4   :  { %s1784_s11 = smov 0   ;;  %s1786_s12 = smov 0  }
   0x5 LB: > { %s1801_s13 = sadd.s32 4294967295, %s1722_s12   ;;  %s1402_s14 = sadd.s32 4294967294, %s1722_s12   ;;  %s1722_s12 = sphi %s1786_s12, %s2315_s12   ;;  %s1718_s11 = sphi %s1784_s11, %s2314_s11   ;;  %s1714_s10 = sphi %s1782_s10, %s2313_s10   ;;  %s1710_s30 = sphi %s1780_s30, %s2312_s30  }
   0x6   : > { %s1805_s15 = sadd.s32 1, %s1722_s12   ;;  %s223_s16 = sadd.s32 1, %s1718_s11 }
   0x7   : > { %s220_s17 = ssub.s32 %s1722_s12, %s1805_s15  ;;  %p233_p0 = scmp.ne.s32.totalorder %s1718_s11, %s1714_s10 }
   0x8   : > { %p221_p1 = scmp.eq.s32.totalorder %s220_s17, 0  ;;  %p234_p2 = scmp.eq.s32.totalorder %s1801_s13, 1 }
   0x9   : > { %p239_p3 = scmp.ne.s32.totalorder %s1714_s10, %s1710_s30  ;;  %p240_p4 = scmp.eq.s32.totalorder %s1402_s14, 1 }
   0xa   : > { %s1816_s18 = scalar_select %p221_p1, %s1718_s11, %s223_s16  }
   0xb   : > { %p1818_p5 = por %p234_p2, %p233_p0  ;;  %p1822_p6 = por %p240_p4, %p239_p3 }
   0xc   : > { %p1405_p7 = scmp.ge.s32.totalorder %s1722_s12, 1  ;;  %p291_p8 = scmp.lt.s32.totalorder %s1722_s12, 3 }
   0xe   : > { %p292_p9 = pnand %p1405_p7, %p291_p8 }
   0xf   : > { %s327_s21 = smul.u32 (!%p292_p9), 38, %s1801_s13  ;;  %s2311_s0 = sld [smem:[#allocation5_spill]] (!%p292_p9) }
  0x10   : > { %295 = sbr.rel (%p292_p9) target bundleno = 2381 (0x94d), region = 56  ;;  %s1726_s14 = smov (!%p292_p9), 16  }
  0x11   : > { %p328_p10 = scmp.lt.s32.totalorder (!%p292_p9), %s327_s21, 75  ;;  %s1728_s29 = smov (!%p292_p9), 96  }
  0x12   : > { %s324_s23 = sand.u32 (!%p292_p9), 1, %s1714_s10   ;;  %s1517_s24 = sshll.u32 (!%p292_p9), %s1801_s13, 3 }
  0x13   : > { %s1338_s28 = scalar_lea.hbm (!%p292_p9), %s2307_s9, %s1517_s24  ;;  %s1680_s27 = scalar_lea.hbm (!%p292_p9), %s2307_s9, 16 }
  0x15   : > { %v1724_v0 = vmov 0   ;;  %s2317_s21 = smov (!%p328_p10, %s327_s21), 75  ;;  %v616_v22 = vld [vmem:[%s2299_s1 + $0x78] sm:$0xff]  ;;  %v615_v23 = vld [vmem:[%s2299_s1 + $0x70] sm:$0xff]  ;;  %v614_v27 = vld [vmem:[%s2299_s1 + $0x68] sm:$0xff]  ;;  %v371_v57 = vlaneseq  ;;  %v1725_v62 = vmov 1.0  }
  0x16   : > { %1615 = vset.pattern.permute.xlu2 %v1724_v0  ;;  %1614 = vset.pattern.permute.xlu1 %v1724_v0  ;;  %s1407_s22 = sshll.u32 %s2317_s21, 3  ;;  %v613_v28 = vld [vmem:[%s2299_s1 + $0x60] sm:$0xff]  ;;  %v612_v29 = vld [vmem:[%s2299_s1 + $0x58] sm:$0xff]  ;;  %v611_v33 = vld [vmem:[%s2299_s1 + $0x50] sm:$0xff]  ;;  %s1342_s21 = sshll.u32 %s1338_s28, 4  ;;  %s1343_s21 = int_to_ptr.hbm [resolvable:$true] %s1342_s21 }
  0x17   : > { %1613 = vset.pattern.permute.xlu0 %v1724_v0  ;;  %s1832_s25 = scalar_lea.vmem %s2311_s0, %s1407_s22  ;;  %617 = vmatpush.msra.mxu0 %v616_v22  ;;  %v610_v34 = vld [vmem:[%s2299_s1 + $0x48] sm:$0xff]  ;;  %v609_v35 = vld [vmem:[%s2299_s1 + $0x40] sm:$0xff]  ;;  %v608_v36 = vld [vmem:[%s2299_s1 + $0x38] sm:$0xff]  ;;  %v1920_v58 = vand.u32 127, %v371_v57  ;;  %s1328_s22 = scalar_lea.sflag [#allocation3], %s324_s23 }
  0x18   : > { %v337_v1 = vld [vmem:[%s1832_s25 + $0x20] sm:$0xff]  ;;  %v335_v2 = vld [vmem:[%s1832_s25 + $0x10] sm:$0xff]  ;;  %v338_v4 = vld [vmem:[%s1832_s25 + $0x28] sm:$0xff]  ;;  %1521 = vmatpush.msra.mxu2 %v616_v22  ;;  %1520 = vmatpush.msra.mxu1 %v616_v22  ;;  %s1674_s0 = sshra.s32 %s1343_s21, 4  ;;  %s1675_s0 = int_to_ptr.hbm [resolvable:$true] %s1674_s0 }
  0x19   : > { %v333_v3 = vld [vmem:[%s1832_s25] sm:$0xff]  ;;  %386 = vperm.xlu2 %1615, %v337_v1   ;;  %380 = vperm.xlu1 %1614, %v335_v2   ;;  %v336_v5 = vld [vmem:[%s1832_s25 + $0x18] sm:$0xff]  ;;  %v334_v6 = vld [vmem:[%s1832_s25 + $0x8] sm:$0xff]  ;;  %s1676_s13 = scalar_lea.hbm %s1675_s0, 8  ;;  %p1681_p0 = scmp.lt.s32.totalorder %s1675_s0, %s2307_s9 }
  0x1a   : > { %374 = vperm.xlu0 %1613, %v333_v3   ;;  %v341_v7 = vld [vmem:[%s1832_s25 + $0x40] sm:$0xff]  ;;  %v340_v8 = vld [vmem:[%s1832_s25 + $0x38] sm:$0xff]  ;;  %v339_v9 = vld [vmem:[%s1832_s25 + $0x30] sm:$0xff]  ;;  %1522 = vmatpush.msra.mxu3 %v616_v22  ;;  %p1677_p11 = scmp.ne.s32.totalorder %s1675_s0, %s1676_s13  ;;  %p1682_p1 = scmp.lt.s32.totalorder %s1680_s27, %s1676_s13 }
  0x1b   : > { %v344_v10 = vld [vmem:[%s1832_s25 + $0x58] sm:$0xff]  ;;  %v343_v11 = vld [vmem:[%s1832_s25 + $0x50] sm:$0xff]  ;;  %v342_v12 = vld [vmem:[%s1832_s25 + $0x48] sm:$0xff]  ;;  %618 = vmatpush.msra.mxu0 %v615_v23  ;;  %1524 = vmatpush.msra.mxu2 %v615_v23 }
  0x1c   : > { %v346_v13 = vld [vmem:[%s1832_s25 + $0x68] sm:$0xff]  ;;  %v360_v14 = vld [vmem:[%s1832_s25 + $0xd8] sm:$0xff]  ;;  %v345_v15 = vld [vmem:[%s1832_s25 + $0x60] sm:$0xff]  ;;  %1523 = vmatpush.msra.mxu1 %v615_v23  ;;  %1525 = vmatpush.msra.mxu3 %v615_v23  ;;  %p1678_p12 = pnand %p1677_p11, %p1818_p5  ;;  %p1683_p2 = por %p1682_p1, %p1681_p0 }
  0x1d   : > { %v347_v16 = vld [vmem:[%s1832_s25 + $0x70] sm:$0xff]  ;;  %v361_v17 = vld [vmem:[%s1832_s25 + $0xe0] sm:$0xff]  ;;  %v354_v18 = vld [vmem:[%s1832_s25 + $0xa8] sm:$0xff]  ;;  %619 = vmatpush.msra.mxu0 %v614_v27  ;;  %1527 = vmatpush.msra.mxu2 %v614_v27 }
  0x1e   : > { %v348_v19 = vld [vmem:[%s1832_s25 + $0x78] sm:$0xff]  ;;  %v362_v20 = vld [vmem:[%s1832_s25 + $0xe8] sm:$0xff]  ;;  %v355_v21 = vld [vmem:[%s1832_s25 + $0xb0] sm:$0xff]  ;;  %1526 = vmatpush.msra.mxu1 %v614_v27  ;;  %1528 = vmatpush.msra.mxu3 %v614_v27  ;;  %p1679_p13 = pneg %p1678_p12 }
  0x1f   : > { %v349_v24 = vld [vmem:[%s1832_s25 + $0x80] sm:$0xff]  ;;  %v363_v25 = vld [vmem:[%s1832_s25 + $0xf0] sm:$0xff]  ;;  %v356_v26 = vld [vmem:[%s1832_s25 + $0xb8] sm:$0xff]  ;;  %620 = vmatpush.msra.mxu0 %v613_v28  ;;  %1530 = vmatpush.msra.mxu2 %v613_v28 }
  0x20   : > { %v364_v30 = vld [vmem:[%s1832_s25 + $0xf8] sm:$0xff]  ;;  %v357_v31 = vld [vmem:[%s1832_s25 + $0xc0] sm:$0xff]  ;;  %1529 = vmatpush.msra.mxu1 %v613_v28  ;;  %1531 = vmatpush.msra.mxu3 %v613_v28  ;;  %v367_v32 = vld [vmem:[%s1832_s25 + $0x110] sm:$0xff]  ;;  %p1684_p3 = pnand %p1683_p2, %p1679_p13 }
  0x21   : > { %389 = vperm.xlu2 %1615, %v338_v4   ;;  %383 = vperm.xlu1 %1614, %v336_v5   ;;  %v358_v37 = vld [vmem:[%s1832_s25 + $0xc8] sm:$0xff]  ;;  %v368_v38 = vld [vmem:[%s1832_s25 + $0x118] sm:$0xff]  ;;  %v607_v40 = vld [vmem:[%s2299_s1 + $0x30] sm:$0xff] }
  0x22   : > { %377 = vperm.xlu0 %1613, %v334_v6   ;;  %621 = vmatpush.msra.mxu0 %v612_v29  ;;  %v350_v39 = vld [vmem:[%s1832_s25 + $0x88] sm:$0xff]  ;;  %v605_v42 = vld [vmem:[%s2299_s1 + $0x20] sm:$0xff]  ;;  %v604_v43 = vld [vmem:[%s2299_s1 + $0x18] sm:$0xff] }
  0x23   : > { %1533 = vmatpush.msra.mxu2 %v612_v29  ;;  %1532 = vmatpush.msra.mxu1 %v612_v29  ;;  %v606_v41 = vld [vmem:[%s2299_s1 + $0x28] sm:$0xff]  ;;  %v359_v44 = vld [vmem:[%s1832_s25 + $0xd0] sm:$0xff]  ;;  %v369_v45 = vld [vmem:[%s1832_s25 + $0x120] sm:$0xff] }
  0x24   : > { %1534 = vmatpush.msra.mxu3 %v612_v29  ;;  %622 = vmatpush.msra.mxu0 %v611_v33  ;;  %v351_v46 = vld [vmem:[%s1832_s25 + $0x90] sm:$0xff]  ;;  %v602_v48 = vld [vmem:[%s2299_s1 + $0x8] sm:$0xff]  ;;  %v601_v49 = vld [vmem:[%s2299_s1] sm:$0xff] }
  0x25   : > { %1536 = vmatpush.msra.mxu2 %v611_v33  ;;  %1535 = vmatpush.msra.mxu1 %v611_v33  ;;  %v603_v47 = vld [vmem:[%s2299_s1 + $0x10] sm:$0xff]  ;;  %v370_v50 = vld [vmem:[%s1832_s25 + $0x128] sm:$0xff]  ;;  %v365_v51 = vld [vmem:[%s1832_s25 + $0x100] sm:$0xff] }
  0x26   : > { %623 = vmatpush.msra.mxu0 %v610_v34  ;;  %1537 = vmatpush.msra.mxu3 %v611_v33  ;;  %v352_v52 = vld [vmem:[%s1832_s25 + $0x98] sm:$0xff]  ;;  %v366_v54 = vld [vmem:[%s1832_s25 + $0x108] sm:$0xff]  ;;  %v353_v55 = vld [vmem:[%s1832_s25 + $0xa0] sm:$0xff]  ;;  %s1406_s25 = sshll.u32 %s324_s23, 3 }
  0x27   : > { %1539 = vmatpush.msra.mxu2 %v610_v34  ;;  %1538 = vmatpush.msra.mxu1 %v610_v34  ;;  %s326_s16 = scalar_lea.vmem [#allocation2], %s1406_s25 }
  0x28   : > { %624 = vmatpush.msra.mxu0 %v609_v35  ;;  %1540 = vmatpush.msra.mxu3 %v610_v34  ;;  %s1340_s17 = sshll.u32 %s326_s16, 4  ;;  %s1341_s17 = int_to_ptr.vmem [resolvable:$true] %s1340_s17 }
  0x29   : > { %398 = vperm.xlu2 %1615, %v341_v7   ;;  %395 = vperm.xlu1 %1614, %v340_v8  }
  0x2a   : > { %392 = vperm.xlu0 %1613, %v339_v9   ;;  %1542 = vmatpush.msra.mxu2 %v609_v35 }
  0x2b   : > { %1541 = vmatpush.msra.mxu1 %v609_v35  ;;  %625 = vmatpush.msra.mxu0 %v608_v36 }
  0x2c   : > { %1543 = vmatpush.msra.mxu3 %v609_v35  ;;  %1545 = vmatpush.msra.mxu2 %v608_v36 }
  0x2d   : > { %626 = vmatpush.msra.mxu0 %v607_v40  ;;  %1544 = vmatpush.msra.mxu1 %v608_v36 }
  0x2e   : > { %1546 = vmatpush.msra.mxu3 %v608_v36  ;;  %1548 = vmatpush.msra.mxu2 %v607_v40 }
  0x2f   : > { %627 = vmatpush.msra.mxu0 %v606_v41  ;;  %1547 = vmatpush.msra.mxu1 %v607_v40 }
  0x30   : > { %1549 = vmatpush.msra.mxu3 %v607_v40  ;;  %1551 = vmatpush.msra.mxu2 %v606_v41 }
  0x31   : > { %407 = vperm.xlu2 %1615, %v344_v10   ;;  %404 = vperm.xlu1 %1614, %v343_v11  }
  0x32   : > { %401 = vperm.xlu0 %1613, %v342_v12   ;;  %628 = vmatpush.msra.mxu0 %v605_v42 }
  0x33   : > { %1550 = vmatpush.msra.mxu1 %v606_v41  ;;  %1552 = vmatpush.msra.mxu3 %v606_v41 }
  0x34   : > { %629 = vmatpush.msra.mxu0 %v604_v43  ;;  %1554 = vmatpush.msra.mxu2 %v605_v42 }
  0x35   : > { %1553 = vmatpush.msra.mxu1 %v605_v42  ;;  %1555 = vmatpush.msra.mxu3 %v605_v42 }
  0x36   : > { %630 = vmatpush.msra.mxu0 %v603_v47  ;;  %1557 = vmatpush.msra.mxu2 %v604_v43 }
  0x37   : > { %1556 = vmatpush.msra.mxu1 %v604_v43  ;;  %1558 = vmatpush.msra.mxu3 %v604_v43 }
  0x38   : > { %631 = vmatpush.msra.mxu0 %v602_v48  ;;  %1560 = vmatpush.msra.mxu2 %v603_v47 }
  0x39   : > { %413 = vperm.xlu2 %1615, %v346_v13   ;;  %455 = vperm.xlu1 %1614, %v360_v14  }
  0x3a   : > { %410 = vperm.xlu0 %1613, %v345_v15   ;;  %632 = vmatpush.msra.mxu0 %v601_v49 }
  0x3b   : > { %1559 = vmatpush.msra.mxu1 %v603_v47  ;;  %1561 = vmatpush.msra.mxu3 %v603_v47 }
  0x3c   : > { %1563 = vmatpush.msra.mxu2 %v602_v48 }
  0x3d   : > { %1562 = vmatpush.msra.mxu1 %v602_v48  ;;  %1564 = vmatpush.msra.mxu3 %v602_v48 }
  0x3e   : > { %1566 = vmatpush.msra.mxu2 %v601_v49 }
  0x3f   : > { %1565 = vmatpush.msra.mxu1 %v601_v49  ;;  %1567 = vmatpush.msra.mxu3 %v601_v49 }
  0x41   : > { %416 = vperm.xlu2 %1615, %v347_v16   ;;  %458 = vperm.xlu1 %1614, %v361_v17  }
  0x42   : > { %437 = vperm.xlu0 %1613, %v354_v18  }
  0x49   : > { %419 = vperm.xlu2 %1615, %v348_v19   ;;  %461 = vperm.xlu1 %1614, %v362_v20  }
  0x4a   : > { %440 = vperm.xlu0 %1613, %v355_v21  }
  0x51   : > { %422 = vperm.xlu2 %1615, %v349_v24   ;;  %464 = vperm.xlu1 %1614, %v363_v25  }
  0x52   : > { %443 = vperm.xlu0 %1613, %v356_v26  }
  0x59   : > { %467 = vperm.xlu2 %1615, %v364_v30   ;;  %446 = vperm.xlu1 %1614, %v357_v31  }
  0x5a   : > { %476 = vperm.xlu0 %1613, %v367_v32  }
  0x61   : > { %449 = vperm.xlu2 %1615, %v358_v37   ;;  %479 = vperm.xlu1 %1614, %v368_v38  }
  0x62   : > { %425 = vperm.xlu0 %1613, %v350_v39  }
  0x69   : > { %452 = vperm.xlu2 %1615, %v359_v44   ;;  %482 = vperm.xlu1 %1614, %v369_v45  }
  0x6a   : > { %428 = vperm.xlu0 %1613, %v351_v46  }
  0x71   : > { %485 = vperm.xlu2 %1615, %v370_v50   ;;  %470 = vperm.xlu1 %1614, %v365_v51  }
  0x72   : > { %431 = vperm.xlu0 %1613, %v352_v52  }
  0x73   : > { %v387_v53 = vpop.permute.xlu2 %386 }
  0x74   : > { %vm491_vm4 = vcmp.eq.s32.totalorder %v1920_v58, %v387_v53 }
  0x79   : > { %473 = vperm.xlu1 %1614, %v366_v54  }
  0x7a   : > { %434 = vperm.xlu0 %1613, %v353_v55  }
  0x7b   : > { %v390_v56 = vpop.permute.xlu2 %389 }
  0x7c   : > { %vm492_vm7 = vcmp.eq.s32.totalorder %v1920_v58, %v390_v56 }
  0x83   : > { %v399_v59 = vpop.permute.xlu2 %398 }
  0x8b   : > { %v381_v60 = vpop.permute.xlu1 %380  ;;  %v1924_v63 = vpop.permute.xlu2 %407 }
  0x8c   : > { %v375_v61 = vpop.permute.xlu0 %374  ;;  %vm489_vm2 = vcmp.eq.s32.totalorder %v1920_v58, %v381_v60 }
  0x8d   : > { %vm487_vm0 = vcmp.eq.s32.totalorder %v1920_v58, %v375_v61 }
  0x8e   : > { %1446 = vmatmul.msk.f32.vlgmr.msra.gmra.mxu0 %vm487_vm0, %v1725_v62 }
  0x93   : > { %v384_v0 = vpop.permute.xlu1 %383  ;;  %v1929_v4 = vpop.permute.xlu2 %413 }
  0x94   : > { %v378_v1 = vpop.permute.xlu0 %377  ;;  %vm490_vm3 = vcmp.eq.s32.totalorder %v1920_v58, %v384_v0 }
  0x95   : > { %vm488_vm1 = vcmp.eq.s32.totalorder %v1920_v58, %v378_v1 }
  0x96   : > { %1447 = vmatmul.msk.f32.gmra.mxu0 %vm488_vm1, %v1725_v62  ;;  %vm495_vm1 = vcmp.eq.s32.totalorder %v1920_v58, %v399_v59 }
  0x9b   : > { %v396_v2 = vpop.permute.xlu1 %395  ;;  %v1934_v7 = vpop.permute.xlu2 %416 }
  0x9c   : > { %v393_v3 = vpop.permute.xlu0 %392  ;;  %vm494_vm13 = vcmp.eq.s32.totalorder %v1920_v58, %v396_v2 }
  0x9d   : > { %vm493_vm10 = vcmp.eq.s32.totalorder %v1920_v58, %v393_v3  ;;  %v750_v3 = vld [vmem:[%s2300_s2 + $0x10] sm:$0xff] }
  0x9e   : > { %1448 = vmatmul.msk.f32.gmra.mxu0 %vm489_vm2, %v1725_v62 }
  0xa3   : > { %v405_v5 = vpop.permute.xlu1 %404  ;;  %v1942_v10 = vpop.permute.xlu2 %419 }
  0xa4   : > { %v402_v6 = vpop.permute.xlu0 %401 }
  0xa6   : > { %1449 = vmatmul.msk.f32.gmra.mxu0 %vm490_vm3, %v1725_v62 }
  0xab   : > { %v456_v8 = vpop.permute.xlu1 %455  ;;  %v1950_v13 = vpop.permute.xlu2 %422 }
  0xac   : > { %vm514_vm5 = vcmp.eq.s32.totalorder %v1920_v58, %v456_v8  ;;  %v1938_v9 = vpop.permute.xlu0 %410 }
  0xad   : > { %1473 = vmatmul.msk.f32.vlgmr.msra.gmra.mxu2 %vm514_vm5, %v1725_v62 }
  0xae   : > { %1450 = vmatmul.msk.f32.gmra.mxu0 %vm491_vm4, %v1725_v62  ;;  %vm496_vm4 = vcmp.eq.s32.totalorder %v1920_v58, %v402_v6  ;;  %v997_v6 = vld [vmem:[%s2303_s5 + $0x10] sm:$0xff] }
  0xaf   : > { %1007 = vrot.lane.b32.xlu1 %v997_v6, %s1726_s14 }
  0xb3   : > { %v459_v11 = vpop.permute.xlu1 %458  ;;  %v468_v18 = vpop.permute.xlu2 %467 }
  0xb4   : > { %vm515_vm6 = vcmp.eq.s32.totalorder %v1920_v58, %v459_v11  ;;  %v438_v12 = vpop.permute.xlu0 %437  ;;  %vm518_vm15 = vcmp.eq.s32.totalorder %v1920_v58, %v468_v18  ;;  %v998_v11 = vld [vmem:[%s2303_s5 + $0x18] sm:$0xff]  ;;  %v762_v18 = vld [vmem:[%s2300_s2 + $0x70] sm:$0xff] }
  0xb5   : > { %vm508_vm8 = vcmp.eq.s32.totalorder %v1920_v58, %v438_v12  ;;  %1474 = vmatmul.msk.f32.gmra.mxu2 %vm515_vm6, %v1725_v62  ;;  %1009 = vrot.lane.b32.xlu0 %v998_v11, %s1726_s14  ;;  %v751_v12 = vld [vmem:[%s2300_s2 + $0x18] sm:$0xff] }
  0xb6   : > { %1451 = vmatmul.msk.f32.gmra.mxu0 %vm492_vm7, %v1725_v62  ;;  %1467 = vmatmul.msk.f32.vlgmr.msra.gmra.mxu1 %vm508_vm8, %v1725_v62  ;;  %vm497_vm7 = vcmp.eq.s32.totalorder %v1920_v58, %v405_v5  ;;  %v753_v5 = vld [vmem:[%s2300_s2 + $0x28] sm:$0xff] }
  0xbb   : > { %v462_v14 = vpop.permute.xlu1 %461  ;;  %v450_v21 = vpop.permute.xlu2 %449 }
  0xbc   : > { %vm516_vm9 = vcmp.eq.s32.totalorder %v1920_v58, %v462_v14  ;;  %v441_v15 = vpop.permute.xlu0 %440  ;;  %vm512_vm5 = vcmp.eq.s32.totalorder %v1920_v58, %v450_v21  ;;  %v759_v14 = vld [vmem:[%s2300_s2 + $0x58] sm:$0xff]  ;;  %v765_v21 = vld [vmem:[%s2300_s2 + $0x88] sm:$0xff] }
  0xbd   : > { %vm509_vm11 = vcmp.eq.s32.totalorder %v1920_v58, %v441_v15  ;;  %1475 = vmatmul.msk.f32.gmra.mxu2 %vm516_vm9, %v1725_v62  ;;  %v996_v15 = vld [vmem:[%s2303_s5 + $0x8] sm:$0xff] }
  0xbe   : > { %1452 = vmatmul.msk.f32.gmra.mxu0 %vm493_vm10, %v1725_v62  ;;  %1468 = vmatmul.msk.f32.gmra.mxu1 %vm509_vm11, %v1725_v62  ;;  %vm498_vm10 = vcmp.eq.s32.totalorder %v1920_v58, %v1924_v63 }
  0xbf   : > { %1005 = vrot.lane.b32.xlu0 %v996_v15, %s1726_s14 }
  0xc3   : > { %v465_v16 = vpop.permute.xlu1 %464  ;;  %v453_v23 = vpop.permute.xlu2 %452 }
  0xc4   : > { %vm517_vm12 = vcmp.eq.s32.totalorder %v1920_v58, %v465_v16  ;;  %v444_v17 = vpop.permute.xlu0 %443  ;;  %vm513_vm8 = vcmp.eq.s32.totalorder %v1920_v58, %v453_v23  ;;  %v754_v16 = vld [vmem:[%s2300_s2 + $0x30] sm:$0xff]  ;;  %v755_v23 = vld [vmem:[%s2300_s2 + $0x38] sm:$0xff] }
  0xc5   : > { %vm510_vm14 = vcmp.eq.s32.totalorder %v1920_v58, %v444_v17  ;;  %1476 = vmatmul.msk.f32.gmra.mxu2 %vm517_vm12, %v1725_v62  ;;  %v749_v17 = vld [vmem:[%s2300_s2 + $0x8] sm:$0xff] }
  0xc6   : > { %1453 = vmatmul.msk.f32.gmra.mxu0 %vm494_vm13, %v1725_v62  ;;  %1469 = vmatmul.msk.f32.gmra.mxu1 %vm510_vm14, %v1725_v62  ;;  %vm499_vm13 = vcmp.eq.s32.totalorder %v1920_v58, %v1938_v9  ;;  %vm500_vm14 = vcmp.eq.s32.totalorder %v1920_v58, %v1929_v4  ;;  %v756_v9 = vld [vmem:[%s2300_s2 + $0x40] sm:$0xff] }
  0xcb   : > { %v447_v19 = vpop.permute.xlu1 %446  ;;  %v486_v25 = vpop.permute.xlu2 %485 }
  0xcc   : > { %vm511_vm0 = vcmp.eq.s32.totalorder %v1920_v58, %v447_v19  ;;  %v477_v20 = vpop.permute.xlu0 %476  ;;  %vm524_vm11 = vcmp.eq.s32.totalorder %v1920_v58, %v486_v25  ;;  %v757_v19 = vld [vmem:[%s2300_s2 + $0x48] sm:$0xff]  ;;  %v763_v25 = vld [vmem:[%s2300_s2 + $0x78] sm:$0xff] }
  0xcd   : > { %vm521_vm2 = vcmp.eq.s32.totalorder %v1920_v58, %v477_v20  ;;  %1477 = vmatmul.msk.f32.gmra.mxu2 %vm518_vm15, %v1725_v62  ;;  %vm501_vm15 = vcmp.eq.s32.totalorder %v1920_v58, %v1934_v7  ;;  %v748_v7 = vld [vmem:[%s2300_s2] sm:$0xff] }
  0xce   : > { %1454 = vmatmul.msk.f32.gmra.mxu0 %vm495_vm1, %v1725_v62  ;;  %1470 = vmatmul.msk.f32.gmra.mxu1 %vm511_vm0, %v1725_v62  ;;  %vm502_vm0 = vcmp.eq.s32.totalorder %v1920_v58, %v1942_v10  ;;  %vm503_vm1 = vcmp.eq.s32.totalorder %v1920_v58, %v1950_v13  ;;  %v995_v10 = vld [vmem:[%s2303_s5] sm:$0xff] }
  0xcf   : > { %1480 = vmatmul.msk.f32.vlgmr.msra.gmra.mxu3 %vm521_vm2, %v1725_v62  ;;  %1003 = vrot.lane.b32.xlu1 %v995_v10, %s1726_s14  ;;  %v752_v20 = vld [vmem:[%s2300_s2 + $0x20] sm:$0xff]  ;;  %s1727_s14 = smov 112  }
  0xd3   : > { %v480_v22 = vpop.permute.xlu1 %479 }
  0xd4   : > { %vm522_vm3 = vcmp.eq.s32.totalorder %v1920_v58, %v480_v22  ;;  %v426_v29 = vpop.permute.xlu0 %425  ;;  %v760_v22 = vld [vmem:[%s2300_s2 + $0x60] sm:$0xff] }
  0xd5   : > { %vm504_vm2 = vcmp.eq.s32.totalorder %v1920_v58, %v426_v29  ;;  %v761_v29 = vld [vmem:[%s2300_s2 + $0x68] sm:$0xff] }
  0xd6   : > { %1455 = vmatmul.msk.f32.gmra.mxu0 %vm496_vm4, %v1725_v62  ;;  %1471 = vmatmul.msk.f32.gmra.mxu1 %vm512_vm5, %v1725_v62 }
  0xd7   : > { %1481 = vmatmul.msk.f32.gmra.mxu3 %vm522_vm3, %v1725_v62 }
  0xdb   : > { %v483_v24 = vpop.permute.xlu1 %482 }
  0xdc   : > { %vm523_vm6 = vcmp.eq.s32.totalorder %v1920_v58, %v483_v24  ;;  %v429_v31 = vpop.permute.xlu0 %428  ;;  %v768_v24 = vld [vmem:[%s2300_s2 + $0xa0] sm:$0xff] }
  0xdd   : > { %vm505_vm3 = vcmp.eq.s32.totalorder %v1920_v58, %v429_v31  ;;  %v769_v31 = vld [vmem:[%s2300_s2 + $0xa8] sm:$0xff] }
  0xde   : > { %1456 = vmatmul.msk.f32.gmra.mxu0 %vm497_vm7, %v1725_v62  ;;  %1472 = vmatmul.msk.f32.gmra.mxu1 %vm513_vm8, %v1725_v62  ;;  %vm1040_vm7 = vcmask 130048   ;;  %vm1076_vm8 = vcmask 261120  }
  0xdf   : > { %1482 = vmatmul.msk.f32.gmra.mxu3 %vm523_vm6, %v1725_v62  ;;  %vm787_vm6 = vcmask 392192  }
  0xe3   : > { %v471_v26 = vpop.permute.xlu1 %470 }
  0xe4   : > { %vm519_vm9 = vcmp.eq.s32.totalorder %v1920_v58, %v471_v26  ;;  %v432_v33 = vpop.permute.xlu0 %431  ;;  %v758_v26 = vld [vmem:[%s2300_s2 + $0x50] sm:$0xff] }
  0xe5   : > { %1478 = vmatmul.msk.f32.gmra.mxu2 %vm519_vm9, %v1725_v62  ;;  %vm506_vm4 = vcmp.eq.s32.totalorder %v1920_v58, %v432_v33  ;;  %v777_v33 = vld [vmem:[%s2300_s2 + $0xe8] sm:$0xff] }
  0xe6   : > { %1457 = vmatmul.msk.f32.gmra.mxu0 %vm498_vm10, %v1725_v62 }
  0xe7   : > { %1483 = vmatmul.msk.f32.gmra.mxu3 %vm524_vm11, %v1725_v62 }
  0xeb   : > { %v474_v27 = vpop.permute.xlu1 %473 }
  0xec   : > { %vm520_vm12 = vcmp.eq.s32.totalorder %v1920_v58, %v474_v27  ;;  %v435_v35 = vpop.permute.xlu0 %434  ;;  %v771_v27 = vld [vmem:[%s2300_s2 + $0xb8] sm:$0xff] }
  0xed   : > { %1479 = vmatmul.msk.f32.gmra.mxu2 %vm520_vm12, %v1725_v62  ;;  %vm507_vm5 = vcmp.eq.s32.totalorder %v1920_v58, %v435_v35  ;;  %v767_v35 = vld [vmem:[%s2300_s2 + $0x98] sm:$0xff] }
  0xee   : > { %1458 = vmatmul.msk.f32.gmra.mxu0 %vm499_vm13, %v1725_v62 }
  0xf6   : > { %1459 = vmatmul.msk.f32.gmra.mxu0 %vm500_vm14, %v1725_v62 }
  0xfe   : > { %1460 = vmatmul.msk.f32.gmra.mxu0 %vm501_vm15, %v1725_v62 }
 0x106   : > { %1461 = vmatmul.msk.f32.gmra.mxu0 %vm502_vm0, %v1725_v62 }
 0x10b   : > { %v2005_v28 = vpop.f32.mrf.mxu0 }
 0x10e   : > { %1462 = vmatmul.msk.f32.gmra.mxu0 %vm503_vm1, %v1725_v62 }
 0x113   : > { %v2010_v30 = vpop.f32.mrf.mxu0 }
 0x116   : > { %1463 = vmatmul.msk.f32.gmra.mxu0 %vm504_vm2, %v1725_v62 }
 0x11b   : > { %v2014_v32 = vpop.f32.mrf.mxu0 }
 0x11e   : > { %1464 = vmatmul.msk.f32.gmra.mxu0 %vm505_vm3, %v1725_v62 }
 0x123   : > { %v2018_v34 = vpop.f32.mrf.mxu0 }
 0x126   : > { %1465 = vmatmul.msk.f32.gmra.mxu0 %vm506_vm4, %v1725_v62 }
 0x12b   : > { %v2022_v36 = vpop.f32.mrf.mxu0 }
 0x12e   : > { %1466 = vmatmul.msk.f32.gmra.mxu0 %vm507_vm5, %v1725_v62 }
 0x130   : > { %v715_v37 = vpop.f32.mrf.mxu2 }
 0x133   : > { %v649_v38 = vpop.f32.mrf.mxu0  ;;  %v697_v39 = vpop.f32.mrf.mxu1 }
 0x138   : > { %v718_v40 = vpop.f32.mrf.mxu2 }
 0x13b   : > { %v652_v41 = vpop.f32.mrf.mxu0  ;;  %v700_v42 = vpop.f32.mrf.mxu1 }
 0x140   : > { %v721_v43 = vpop.f32.mrf.mxu2 }
 0x143   : > { %v655_v44 = vpop.f32.mrf.mxu0  ;;  %v703_v45 = vpop.f32.mrf.mxu1 }
 0x148   : > { %v724_v46 = vpop.f32.mrf.mxu2 }
 0x14b   : > { %v658_v47 = vpop.f32.mrf.mxu0  ;;  %v706_v48 = vpop.f32.mrf.mxu1 }
 0x150   : > { %v727_v49 = vpop.f32.mrf.mxu2 }
 0x151   : > { %883 = vmatpush.msrb.mxu2 %v727_v49 }
 0x152   : > { %v736_v50 = vpop.f32.mrf.mxu3 }
 0x153   : > { %v661_v51 = vpop.f32.mrf.mxu0  ;;  %v709_v52 = vpop.f32.mrf.mxu1  ;;  %884 = vmatpush.msrb.mxu2 %v724_v46  ;;  %v779_v46 = vld [vmem:[%s2300_s2 + $0xf8] sm:$0xff] }
 0x155   : > { %885 = vmatpush.msrb.mxu2 %v721_v43  ;;  %v781_v43 = vld [vmem:[%s2300_s2 + $0x108] sm:$0xff] }
 0x157   : > { %886 = vmatpush.msrb.mxu2 %v718_v40  ;;  %v778_v40 = vld [vmem:[%s2300_s2 + $0xf0] sm:$0xff] }
 0x159   : > { %887 = vmatpush.msrb.mxu2 %v715_v37  ;;  %v775_v37 = vld [vmem:[%s2300_s2 + $0xd8] sm:$0xff] }
 0x15a   : > { %v739_v53 = vpop.f32.mrf.mxu3 }
 0x15b   : > { %v664_v54 = vpop.f32.mrf.mxu0  ;;  %v712_v55 = vpop.f32.mrf.mxu1 }
 0x15c   : > { %888 = vmatpush.msrb.mxu2 %v712_v55  ;;  %v1008_v55 = vpop.permute.xlu1 %1007 }
 0x15e   : > { %889 = vmatpush.msrb.mxu2 %v709_v52 }
 0x160   : > { %890 = vmatpush.msrb.mxu2 %v706_v48  ;;  %v785_v48 = vld [vmem:[%s2300_s2 + $0x128] sm:$0xff] }
 0x162   : > { %v742_v56 = vpop.f32.mrf.mxu3  ;;  %891 = vmatpush.msrb.mxu2 %v703_v45  ;;  %v784_v45 = vld [vmem:[%s2300_s2 + $0x120] sm:$0xff] }
 0x163   : > { %v667_v57 = vpop.f32.mrf.mxu0 }
 0x164   : > { %892 = vmatpush.msrb.mxu2 %v700_v42  ;;  %v786_v42 = vld [vmem:[%s2300_s2 + $0x130] sm:$0xff] }
 0x166   : > { %893 = vmatpush.msrb.mxu2 %v697_v39  ;;  %v783_v39 = vld [vmem:[%s2300_s2 + $0x118] sm:$0xff] }
 0x168   : > { %v730_v58 = vpop.f32.mrf.mxu2 }
 0x16a   : > { %v745_v59 = vpop.f32.mrf.mxu3 }
 0x16b   : > { %949 = vmatpush.msrb.mxu3 %v745_v59  ;;  %v670_v60 = vpop.f32.mrf.mxu0 }
 0x16d   : > { %950 = vmatpush.msrb.mxu3 %v742_v56 }
 0x16f   : > { %951 = vmatpush.msrb.mxu3 %v739_v53 }
 0x170   : > { %v733_v61 = vpop.f32.mrf.mxu2 }
 0x171   : > { %952 = vmatpush.msrb.mxu3 %v736_v50 }
 0x173   : > { %953 = vmatpush.msrb.mxu3 %v733_v61  ;;  %v673_v62 = vpop.f32.mrf.mxu0 }
 0x175   : > { %954 = vmatpush.msrb.mxu3 %v730_v58 }
 0x176   : > { %1484 = vmatmul.msk.f32.vlgmr.msrb.gmra.mxu3 %vm787_vm6, %v750_v3 }
 0x17b   : > { %v676_v63 = vpop.f32.mrf.mxu0 }
 0x17e   : > { %1485 = vmatmul.msk.f32.gmra.mxu3 %vm787_vm6, %v753_v5 }
 0x183   : > { %v679_v0 = vpop.f32.mrf.mxu0 }
 0x184   : > { %827 = vmatpush.msrb.mxu1 %v679_v0  ;;  %v1004_v0 = vpop.permute.xlu1 %1003 }
 0x186   : > { %828 = vmatpush.msrb.mxu1 %v676_v63  ;;  %1486 = vmatmul.msk.f32.gmra.mxu3 %vm787_vm6, %v756_v9 }
 0x188   : > { %829 = vmatpush.msrb.mxu1 %v673_v62 }
 0x18a   : > { %830 = vmatpush.msrb.mxu1 %v670_v60 }
 0x18b   : > { %v682_v1 = vpop.f32.mrf.mxu0 }
 0x18c   : > { %831 = vmatpush.msrb.mxu1 %v667_v57  ;;  %v1010_v57 = vpop.permute.xlu0 %1009 }
 0x18e   : > { %832 = vmatpush.msrb.mxu1 %v664_v54  ;;  %1487 = vmatmul.msk.f32.gmra.mxu3 %vm787_vm6, %v759_v14 }
 0x190   : > { %833 = vmatpush.msrb.mxu1 %v661_v51 }
 0x192   : > { %834 = vmatpush.msrb.mxu1 %v658_v47  ;;  %v782_v47 = vld [vmem:[%s2300_s2 + $0x110] sm:$0xff] }
 0x193   : > { %v685_v2 = vpop.f32.mrf.mxu0 }
 0x194   : > { %835 = vmatpush.msrb.mxu1 %v655_v44  ;;  %v776_v44 = vld [vmem:[%s2300_s2 + $0xe0] sm:$0xff] }
 0x196   : > { %836 = vmatpush.msrb.mxu1 %v652_v41  ;;  %1488 = vmatmul.msk.f32.gmra.mxu3 %vm787_vm6, %v762_v18  ;;  %v773_v41 = vld [vmem:[%s2300_s2 + $0xc8] sm:$0xff] }
 0x198   : > { %837 = vmatpush.msrb.mxu1 %v649_v38  ;;  %v770_v38 = vld [vmem:[%s2300_s2 + $0xb0] sm:$0xff] }
 0x19a   : > { %838 = vmatpush.msrb.mxu1 %v2022_v36  ;;  %v780_v36 = vld [vmem:[%s2300_s2 + $0x100] sm:$0xff] }
 0x19b   : > { %v688_v4 = vpop.f32.mrf.mxu0 }
 0x19c   : > { %839 = vmatpush.msrb.mxu1 %v2018_v34  ;;  %v772_v34 = vld [vmem:[%s2300_s2 + $0xc0] sm:$0xff] }
 0x19e   : > { %840 = vmatpush.msrb.mxu1 %v2014_v32  ;;  %1489 = vmatmul.msk.f32.gmra.mxu3 %vm787_vm6, %v765_v21  ;;  %v764_v32 = vld [vmem:[%s2300_s2 + $0x80] sm:$0xff] }
 0x1a0   : > { %841 = vmatpush.msrb.mxu1 %v2010_v30  ;;  %v774_v30 = vld [vmem:[%s2300_s2 + $0xd0] sm:$0xff] }
 0x1a2   : > { %842 = vmatpush.msrb.mxu1 %v2005_v28  ;;  %v766_v28 = vld [vmem:[%s2300_s2 + $0x90] sm:$0xff] }
 0x1a3   : > { %v691_v8 = vpop.f32.mrf.mxu0  ;;  %843 = vmatmul.f32.vlgmr.msrb.gmra.mxu1 %v748_v7 }
 0x1a6   : > { %1490 = vmatmul.msk.f32.gmra.mxu3 %vm787_vm6, %v768_v24 }
 0x1ab   : > { %v694_v13 = vpop.f32.mrf.mxu0  ;;  %846 = vmatmul.f32.gmra.mxu1 %v751_v12 }
 0x1ac   : > { %894 = vmatpush.msrb.mxu2 %v694_v13 }
 0x1ae   : > { %895 = vmatpush.msrb.mxu2 %v691_v8  ;;  %1491 = vmatmul.msk.f32.gmra.mxu3 %vm787_vm6, %v771_v27 }
 0x1b0   : > { %896 = vmatpush.msrb.mxu2 %v688_v4 }
 0x1b2   : > { %897 = vmatpush.msrb.mxu2 %v685_v2 }
 0x1b3   : > { %849 = vmatmul.f32.gmra.mxu1 %v754_v16 }
 0x1b4   : > { %898 = vmatpush.msrb.mxu2 %v682_v1  ;;  %v1006_v1 = vpop.permute.xlu0 %1005 }
 0x1b5   : > { %899 = vmatmul.f32.vlgmr.msrb.gmra.mxu2 %v749_v17 }
 0x1b6   : > { %1492 = vmatmul.msk.f32.gmra.mxu3 %vm787_vm6, %v774_v30 }
 0x1bb   : > { %852 = vmatmul.f32.gmra.mxu1 %v757_v19 }
 0x1bd   : > { %902 = vmatmul.f32.gmra.mxu2 %v752_v20 }
 0x1be   : > { %1493 = vmatmul.msk.f32.gmra.mxu3 %vm787_vm6, %v777_v33 }
 0x1c3   : > { %855 = vmatmul.f32.gmra.mxu1 %v760_v22 }
 0x1c5   : > { %905 = vmatmul.f32.gmra.mxu2 %v755_v23 }
 0x1c6   : > { %1494 = vmatmul.msk.f32.gmra.mxu3 %vm787_vm6, %v780_v36 }
 0x1cb   : > { %858 = vmatmul.f32.gmra.mxu1 %v763_v25 }
 0x1cd   : > { %908 = vmatmul.f32.gmra.mxu2 %v758_v26 }
 0x1ce   : > { %1495 = vmatmul.msk.f32.gmra.mxu3 %vm787_vm6, %v783_v39 }
 0x1d3   : > { %861 = vmatmul.f32.gmra.mxu1 %v766_v28 }
 0x1d5   : > { %911 = vmatmul.f32.gmra.mxu2 %v761_v29 }
 0x1d6   : > { %1496 = vmatmul.msk.f32.gmra.mxu3 %vm787_vm6, %v786_v42 }
 0x1db   : > { %864 = vmatmul.f32.gmra.mxu1 %v769_v31 }
 0x1dd   : > { %914 = vmatmul.f32.gmra.mxu2 %v764_v32 }
 0x1e3   : > { %867 = vmatmul.f32.gmra.mxu1 %v772_v34 }
 0x1e5   : > { %917 = vmatmul.f32.gmra.mxu2 %v767_v35 }
 0x1eb   : > { %870 = vmatmul.f32.gmra.mxu1 %v775_v37 }
 0x1ed   : > { %920 = vmatmul.f32.gmra.mxu2 %v770_v38 }
 0x1f3   : > { %873 = vmatmul.f32.gmra.mxu1 %v778_v40 }
 0x1f5   : > { %923 = vmatmul.f32.gmra.mxu2 %v773_v41 }
 0x1f9   : > { %v956_v50 = vpop.f32.mrf.mxu3 }
 0x1fb   : > { %876 = vmatmul.f32.gmra.mxu1 %v781_v43 }
 0x1fd   : > { %926 = vmatmul.f32.gmra.mxu2 %v776_v44 }
 0x201   : > { %v959_v52 = vpop.f32.mrf.mxu3 }
 0x203   : > { %879 = vmatmul.f32.gmra.mxu1 %v784_v45 }
 0x205   : > { %929 = vmatmul.f32.gmra.mxu2 %v779_v46 }
 0x209   : > { %v962_v54 = vpop.f32.mrf.mxu3 }
 0x20d   : > { %932 = vmatmul.f32.gmra.mxu2 %v782_v47 }
 0x211   : > { %v965_v60 = vpop.f32.mrf.mxu3 }
 0x215   : > { %935 = vmatmul.f32.gmra.mxu2 %v785_v48 }
 0x219   : > { %v968_v8 = vpop.f32.mrf.mxu3 }
 0x220   : > { %v844_v49 = vpop.f32.mrf.mxu1 }
 0x221   : > { %v971_v14 = vpop.f32.mrf.mxu3 }
 0x228   : > { %v847_v51 = vpop.f32.mrf.mxu1 }
 0x229   : > { %v974_v23 = vpop.f32.mrf.mxu3 }
 0x230   : > { %v850_v53 = vpop.f32.mrf.mxu1 }
 0x231   : > { %v977_v28 = vpop.f32.mrf.mxu3 }
 0x238   : > { %v900_v56 = vpop.f32.mrf.mxu2  ;;  %v853_v58 = vpop.f32.mrf.mxu1 }
 0x239   : > { %v901_v59 = vadd.f32 %v900_v56, %v844_v49  ;;  %v980_v32 = vpop.f32.mrf.mxu3 }
 0x23b   : > { %v957_v62 = vadd.f32 %v956_v50, %v901_v59  ;;  %v1034_v59 = vld [vmem:[%s2302_s4 + $0x18] sm:$0xff] }
 0x23d   : > { %v1015_v3 = vadd.f32 %v1004_v0, %v957_v62 }
 0x240   : > { %v903_v61 = vpop.f32.mrf.mxu2  ;;  %v856_v5 = vpop.f32.mrf.mxu1 }
 0x241   : > { %v904_v63 = vadd.f32 %v903_v61, %v847_v51  ;;  %v983_v35 = vpop.f32.mrf.mxu3 }
 0x243   : > { %v960_v2 = vadd.f32 %v959_v52, %v904_v63  ;;  %v1646_v52 = vld [vmem:[%s2301_s3] ss:$0 sm:$0xff] }
 0x245   : > { %v1016_v4 = vadd.f32 %v1006_v1, %v960_v2 }
 0x247   : > { %v2173_v6 = vpack.i.bf16 %v1015_v3, %v1016_v4  ;;  %v1033_v3 = vld [vmem:[%s2302_s4 + $0x10] sm:$0xff] }
 0x248   : > { %v906_v7 = vpop.f32.mrf.mxu2  ;;  %v859_v11 = vpop.f32.mrf.mxu1 }
 0x249   : > { %v907_v9 = vadd.f32 %v906_v7, %v850_v53  ;;  %v986_v38 = vpop.f32.mrf.mxu3 }
 0x24b   : > { %v963_v12 = vadd.f32 %v962_v54, %v907_v9  ;;  %v1032_v9 = vld [vmem:[%s2302_s4 + $0x8] sm:$0xff] }
 0x24d   : > { %v1017_v16 = vadd.f32 %v1008_v55, %v963_v12  ;;  %v1031_v12 = vld [vmem:[%s2302_s4] sm:$0xff] }
 0x250   : > { %v909_v10 = vpop.f32.mrf.mxu2  ;;  %v862_v21 = vpop.f32.mrf.mxu1 }
 0x251   : > { %v910_v13 = vadd.f32 %v909_v10, %v853_v58  ;;  %v989_v41 = vpop.f32.mrf.mxu3 }
 0x253   : > { %v966_v15 = vadd.f32 %v965_v60, %v910_v13 }
 0x255   : > { %v1018_v17 = vadd.f32 %v1010_v57, %v966_v15 }
 0x257   : > { %v2175_v18 = vpack.i.bf16 %v1017_v16, %v1018_v17 }
 0x258   : > { %v912_v19 = vpop.f32.mrf.mxu2  ;;  %v865_v27 = vpop.f32.mrf.mxu1 }
 0x259   : > { %v913_v20 = vadd.f32 %v912_v19, %v856_v5  ;;  %1617 = vrot.lane.b32.xlu1 %v2175_v18, %s1727_s14  ;;  %v992_v47 = vpop.f32.mrf.mxu3 }
 0x25b   : > { %v2179_v22 = vadd.f32 %v968_v8, %v913_v20 }
 0x260   : > { %v915_v24 = vpop.f32.mrf.mxu2  ;;  %v868_v30 = vpop.f32.mrf.mxu1 }
 0x261   : > { %v916_v25 = vadd.f32 %v915_v24, %v859_v11  ;;  %1622 = vrot.lane.b32.xlu1 %v2173_v6, %s1727_s14 }
 0x263   : > { %v972_v26 = vadd.f32 %v971_v14, %v916_v25 }
 0x268   : > { %v918_v29 = vpop.f32.mrf.mxu2  ;;  %v871_v34 = vpop.f32.mrf.mxu1 }
 0x269   : > { %v919_v60 = vadd.f32 %v918_v29, %v862_v21 }
 0x26b   : > { %v975_v4 = vadd.f32 %v974_v23, %v919_v60  ;;  %v2219_v23 = vld [vmem:[%s2304_s6] sm:$0xff] }
 0x270   : > { %v921_v31 = vpop.f32.mrf.mxu2  ;;  %v874_v37 = vpop.f32.mrf.mxu1 }
 0x271   : > { %v922_v51 = vadd.f32 %v921_v31, %v865_v27 }
 0x273   : > { %v978_v61 = vadd.f32 %v977_v28, %v922_v51 }
 0x278   : > { %v924_v33 = vpop.f32.mrf.mxu2  ;;  %v877_v40 = vpop.f32.mrf.mxu1 }
 0x279   : > { %v925_v45 = vadd.f32 %v924_v33, %v868_v30 }
 0x27b   : > { %v981_v54 = vadd.f32 %v980_v32, %v925_v45 }
 0x280   : > { %v927_v36 = vpop.f32.mrf.mxu2  ;;  %v880_v44 = vpop.f32.mrf.mxu1 }
 0x281   : > { %v928_v55 = vadd.f32 %v927_v36, %v871_v34 }
 0x283   : > { %v984_v63 = vadd.f32 %v983_v35, %v928_v55 }
 0x285   : > { %v1023_v5 = vmul.f32 %v1646_v52, %v984_v63 }
 0x287   : > { %v1027_v10 = vadd.f32 %v1023_v5, %v972_v26 }
 0x288   : > { %v930_v39 = vpop.f32.mrf.mxu2 }
 0x289   : > { %v931_v48 = vadd.f32 %v930_v39, %v874_v37  ;;  %v2207_v13 = vadd.f32 %v1031_v12, %v1027_v10 }
 0x28b   : > { %v987_v56 = vadd.f32 %v986_v38, %v931_v48 }
 0x28d   : > { %v1024_v0 = vmul.f32 %v1646_v52, %v987_v56 }
 0x28f   : > { %v1028_v7 = vadd.f32 %v1024_v0, %v975_v4 }
 0x290   : > { %v933_v42 = vpop.f32.mrf.mxu2 }
 0x291   : > { %v934_v43 = vadd.f32 %v933_v42, %v877_v40  ;;  %v2198_v11 = vadd.f32 %v1032_v9, %v1028_v7 }
 0x293   : > { %v990_v49 = vadd.f32 %v989_v41, %v934_v43 }
 0x295   : > { %v1025_v57 = vmul.f32 %v1646_v52, %v990_v49 }
 0x297   : > { %v1029_v1 = vadd.f32 %v1025_v57, %v978_v61 }
 0x298   : > { %v936_v46 = vpop.f32.mrf.mxu2 }
 0x299   : > { %v937_v50 = vadd.f32 %v936_v46, %v880_v44  ;;  %v1037_v8 = vadd.f32 %v1033_v3, %v1029_v1 }
 0x29b   : > { %v993_v53 = vadd.f32 %v992_v47, %v937_v50 }
 0x29d   : > { %v1026_v58 = vmul.f32 %v1646_v52, %v993_v53 }
 0x29f   : > { %v1030_v62 = vadd.f32 %v1026_v58, %v981_v54 }
 0x2a1   : > { %v1038_v2 = vadd.f32 %v1034_v59, %v1030_v62 }
 0x2a3   : > { %1497 = vmatpush.xpose.msk.msra.mxu3 %vm1040_vm7, %v1038_v2  ;;  %1133 = vrot.lane.b32.xlu1 %v1038_v2, %s1727_s14 }
 0x2a7   : > { %1498 = vmatpush.xpose.msk.msra.mxu3 %vm1040_vm7, %v1037_v8 }
 0x2ab   : > { %1499 = vmatpush.xpose.msk.msra.mxu3 %vm1040_vm7, %v2198_v11  ;;  %1129 = vrot.lane.b32.xlu1 %v2198_v11, %s1727_s14 }
 0x2af   : > { %1500 = vmatpush.xpose.msk.msra.mxu3 %vm1040_vm7, %v2207_v13 }
 0x2b2   : > { %1501 = vmatmul.msk.f32.vlgmr.msra.gmra.mxu3 %vm1040_vm7, %v2179_v22 }
 0x2b3   : > { %1127 = vrot.lane.b32.xlu1 %v2207_v13, %s1727_s14 }
 0x2cb   : > { %v1618_v14 = vpop.permute.xlu1 %1617 }
 0x2cc   : > { %v1619_v15 = vunpack.i.l.bf16 %v1618_v14  ;;  %v1620_v16 = vunpack.i.h.bf16 %v1618_v14  ;;  %v1298_v14 = vld [vmem:[%s2305_s7 + $0x8] sm:$0xff] }
 0x2ce   : > { %1119 = vmatpush.msrb.mxu3 %v1619_v15  ;;  %v1297_v15 = vld [vmem:[%s2305_s7] sm:$0xff] }
 0x2d0   : > { %1120 = vmatpush.msrb.mxu3 %v1620_v16 }
 0x2d3   : > { %v1623_v17 = vpop.permute.xlu1 %1622 }
 0x2d4   : > { %v1624_v19 = vunpack.i.l.bf16 %v1623_v17  ;;  %v1625_v20 = vunpack.i.h.bf16 %v1623_v17 }
 0x2d6   : > { %1121 = vmatpush.msrb.mxu3 %v1624_v19  ;;  %v1647_v19 = vld [vmem:[%s2306_s8] ss:$0 sm:$0xff] }
 0x2d8   : > { %1122 = vmatpush.msrb.mxu3 %v1625_v20 }
 0x315   : > { %v1134_v21 = vpop.permute.xlu1 %1133 }
 0x316   : > { %1503 = vmatpush.xpose.msk.msra.mxu1 %vm1040_vm7, %v1134_v21 }
 0x31d   : > { %v1130_v30 = vpop.permute.xlu1 %1129 }
 0x325   : > { %v1128_v34 = vpop.permute.xlu1 %1127 }
 0x335   : > { %v1073_v24 = vpop.f32.mrf.mxu3 }
 0x336   : > { %v1074_v25 = vadd.f32 %v1073_v24, %v2219_v23 }
 0x338   : > { %v1077_v26 = vsel %vm1076_vm8, %v1074_v25, -inf }
 0x339   : > { %1078 = vmax.xlane.f32.xlu2 %v1077_v26 }
 0x351   : > { %1131 = vrot.lane.b32.xlu2 %v1037_v8, %s1727_s14  ;;  %s1729_s14 = smov 80  }
 0x3ac   : > { %v1079_v27 = vpop.xlane.xlu2 %1078 }
 0x3ad   : > { %v1080_v28 = vsub.f32 %v1074_v25, %v1079_v27 }
 0x3af   : > { %v1081_v29 = vmul.f32 1.442695, %v1080_v28 }
 0x3b1   : > { %1648 = vpow2.f32 %v1081_v29 }
 0x3b4   : > { %v1132_v31 = vpop.permute.xlu2 %1131 }
 0x3b5   : > { %1504 = vmatpush.xpose.msk.msra.mxu1 %vm1040_vm7, %v1132_v31 }
 0x3b7   : > { %v1649_v32 = vpop.eup %1648 }
 0x3b8   : > { %v1083_v33 = vsel %vm1076_vm8, %v1649_v32, 0.0 }
 0x3b9   : > { %1084 = vadd.xlane.f32.xlu0 %v1083_v33  ;;  %1505 = vmatpush.xpose.msk.msra.mxu1 %vm1040_vm7, %v1130_v30 }
 0x3bd   : > { %1506 = vmatpush.xpose.msk.msra.mxu1 %vm1040_vm7, %v1128_v34 }
 0x3c1   : > { %1320 = vmatpush.msrb.mxu1 %v1298_v14 }
 0x3c3   : > { %1321 = vmatpush.msrb.mxu1 %v1297_v15 }
 0x3cd   : > { %1627 = vrot.lane.b32.xlu0 %v2175_v18, %s1728_s29 }
 0x3d5   : > { %1632 = vrot.lane.b32.xlu0 %v2173_v6, %s1728_s29 }
 0x3dd   : > { %1218 = vrot.lane.b32.xlu0 %v1038_v2, %s1728_s29 }
 0x3e5   : > { %1216 = vrot.lane.b32.xlu0 %v1037_v8, %s1728_s29 }
 0x42c   : > { %v1085_v35 = vpop.xlane.xlu0 %1084 }
 0x42d   : > { %1650 = vrcp.f32 %v1085_v35 }
 0x433   : > { %v1651_v36 = vpop.eup %1650 }
 0x434   : > { %v1087_v37 = vmul.f32 %v1651_v36, %v1649_v32 }
 0x436   : > { %1502 = vmatmul.msk.f32.vlgmr.msrb.gmra.mxu3 %vm1076_vm8, %v1087_v37 }
 0x43f   : > { %v1628_v38 = vpop.permute.xlu0 %1627 }
 0x440   : > { %v1629_v39 = vunpack.i.l.bf16 %v1628_v38  ;;  %v1630_v40 = vunpack.i.h.bf16 %v1628_v38 }
 0x442   : > { %1204 = vmatpush.msra.mxu3 %v1629_v39 }
 0x444   : > { %1205 = vmatpush.msra.mxu3 %v1630_v40 }
 0x447   : > { %v1633_v41 = vpop.permute.xlu0 %1632 }
 0x448   : > { %v1634_v42 = vunpack.i.l.bf16 %v1633_v41  ;;  %v1635_v43 = vunpack.i.h.bf16 %v1633_v41 }
 0x44a   : > { %1206 = vmatpush.msra.mxu3 %v1634_v42 }
 0x44c   : > { %1207 = vmatpush.msra.mxu3 %v1635_v43 }
 0x44f   : > { %v1219_v44 = vpop.permute.xlu0 %1218 }
 0x450   : > { %1509 = vmatpush.xpose.msk.msra.mxu2 %vm1040_vm7, %v1219_v44 }
 0x457   : > { %v1217_v45 = vpop.permute.xlu0 %1216 }
 0x458   : > { %1510 = vmatpush.xpose.msk.msra.mxu2 %vm1040_vm7, %v1217_v45 }
 0x4b9   : > { %v1124_v46 = vpop.f32.mrf.mxu3 }
 0x4ba   : > { %v1125_v47 = vadd.f32 %v1124_v46, %v2179_v22 }
 0x4bc   : > { %1507 = vmatmul.msk.f32.vlgmr.msra.gmra.mxu1 %vm1040_vm7, %v1125_v47 }
 0x539   : > { %v1163_v48 = vpop.f32.mrf.mxu1 }
 0x53a   : > { %v1164_v49 = vadd.f32 %v1163_v48, %v2219_v23 }
 0x53c   : > { %v1166_v50 = vsel %vm1076_vm8, %v1164_v49, -inf }
 0x53d   : > { %1167 = vmax.xlane.f32.xlu1 %v1166_v50 }
 0x556   : > { %1214 = vrot.lane.b32.xlu1 %v2198_v11, %s1728_s29 }
 0x55e   : > { %1637 = vrot.lane.b32.xlu1 %v2175_v18, %s1729_s14 }
 0x566   : > { %1642 = vrot.lane.b32.xlu1 %v2173_v6, %s1729_s14 }
 0x5b0   : > { %v1168_v51 = vpop.xlane.xlu1 %1167 }
 0x5b1   : > { %v1169_v52 = vsub.f32 %v1164_v49, %v1168_v51 }
 0x5b3   : > { %v1170_v53 = vmul.f32 1.442695, %v1169_v52 }
 0x5b5   : > { %1652 = vpow2.f32 %v1170_v53 }
 0x5bb   : > { %v1653_v22 = vpop.eup %1652 }
 0x5bc   : > { %v1172_v54 = vsel %vm1076_vm8, %v1653_v22, 0.0 }
 0x5bd   : > { %1173 = vadd.xlane.f32.xlu2 %v1172_v54 }
 0x5c8   : > { %v1215_v55 = vpop.permute.xlu1 %1214 }
 0x5c9   : > { %1511 = vmatpush.xpose.msk.msra.mxu2 %vm1040_vm7, %v1215_v55 }
 0x5d0   : > { %v1638_v56 = vpop.permute.xlu1 %1637 }
 0x5d1   : > { %v1639_v57 = vunpack.i.l.bf16 %v1638_v56  ;;  %v1640_v58 = vunpack.i.h.bf16 %v1638_v56 }
 0x5d3   : > { %1289 = vmatpush.msrb.mxu3 %v1639_v57 }
 0x5d5   : > { %1212 = vrot.lane.b32.xlu2 %v2207_v13, %s1728_s29  ;;  %1290 = vmatpush.msrb.mxu3 %v1640_v58 }
 0x5d8   : > { %v1643_v6 = vpop.permute.xlu1 %1642 }
 0x5d9   : > { %v1644_v18 = vunpack.i.l.bf16 %v1643_v6  ;;  %v1645_v59 = vunpack.i.h.bf16 %v1643_v6 }
 0x5db   : > { %1291 = vmatpush.msrb.mxu3 %v1644_v18 }
 0x5dd   : > { %1292 = vmatpush.msrb.mxu3 %v1645_v59 }
 0x630   : > { %v1174_v60 = vpop.xlane.xlu2 %1173 }
 0x631   : > { %1654 = vrcp.f32 %v1174_v60 }
 0x637   : > { %v1655_v61 = vpop.eup %1654 }
 0x638   : > { %v1176_v62 = vmul.f32 %v1655_v61, %v1653_v22  ;;  %v1213_v63 = vpop.permute.xlu2 %1212 }
 0x639   : > { %1512 = vmatpush.xpose.msk.msra.mxu2 %vm1040_vm7, %v1213_v63 }
 0x63a   : > { %1508 = vmatmul.msk.f32.vlgmr.msra.gmra.mxu3 %vm1076_vm8, %v1176_v62 }
 0x6bd   : > { %v1209_v0 = vpop.f32.mrf.mxu3 }
 0x6be   : > { %v1210_v1 = vadd.f32 %v1209_v0, %v1125_v47 }
 0x6c0   : > { %1513 = vmatmul.msk.f32.vlgmr.msra.gmra.mxu2 %vm1040_vm7, %v1210_v1 }
 0x743   : > { %v1248_v2 = vpop.f32.mrf.mxu2 }
 0x744   : > { %v1249_v3 = vadd.f32 %v1248_v2, %v2219_v23 }
 0x746   : > { %v1251_v4 = vsel %vm1076_vm8, %v1249_v3, -inf }
 0x747   : > { %1252 = vmax.xlane.f32.xlu0 %v1251_v4 }
 0x7ba   : > { %v1253_v5 = vpop.xlane.xlu0 %1252 }
 0x7bb   : > { %v1254_v7 = vsub.f32 %v1249_v3, %v1253_v5 }
 0x7bd   : > { %v1255_v8 = vmul.f32 1.442695, %v1254_v7 }
 0x7bf   : > { %1656 = vpow2.f32 %v1255_v8 }
 0x7c5   : > { %v1657_v9 = vpop.eup %1656 }
 0x7c6   : > { %v1257_v10 = vsel %vm1076_vm8, %v1657_v9, 0.0 }
 0x7c7   : > { %1258 = vadd.xlane.f32.xlu2 %v1257_v10 }
 0x83a   : > { %v1259_v11 = vpop.xlane.xlu2 %1258 }
 0x83b   : > { %1658 = vrcp.f32 %v1259_v11 }
 0x841   : > { %v1659_v12 = vpop.eup %1658 }
 0x842   : > { %v1261_v13 = vmul.f32 %v1659_v12, %v1657_v9 }
 0x844   : > { %1514 = vmatmul.msk.f32.vlgmr.msrb.gmra.mxu3 %vm1076_vm8, %v1261_v13 }
 0x8c7   : > { %v1294_v16 = vpop.f32.mrf.mxu3 }
 0x8c8   : > { %v1295_v17 = vadd.f32 %v1294_v16, %v1210_v1 }
 0x8ca   : > { %1515 = vmatmul.msk.f32.vlgmr.msrb.gmra.mxu1 %vm1040_vm7, %v1295_v17 }
 0x947   : > { %v1323_v20 = vpop.f32.mrf.mxu1 }
 0x948   : > { %v1324_v21 = vadd.f32 %v1647_v19, %v1323_v20 }
 0x94a   : > { %1326 = vst [vmem:[%s326_s16] sm:$0xff] %v1324_v21 }
 0x94b   : > { %1687 = shalt.err (!%p1684_p3)
}
 0x94c   : > { %1568 = dma.vmem_to_hbm [thread:$0]  (%p1818_p5), %s1341_s17, 128, %s1343_s21, %s1328_s22  }
 0x94d PF: > { %p1574_p4 = scmp.ge.s32.totalorder %s1722_s12, 2  ;;  %s1354_s23 = sand.u32 1, %s1710_s30  }
 0x94e   : > { %s1355_s28 = scalar_lea.sflag [#allocation3], %s1354_s23 }
 0x94f   : > { %p1571_p7 = pnand %p1574_p4, %p1822_p6 }
 0x951   : > { %p1572_p8 = pneg %p1571_p7 }
 0x953   : > { %1705 = dma.done.wait (%p1572_p8), %s1355_s28, 128  }
 0x954   : > { %1707 = vsyncadd (%p1572_p8), %s1355_s28, 4294967168  ;;  %p19_p9 = scmp.ge.s32.totalorder %s1805_s15, 4   ;;  %s2312_s30 = smov %s1714_s10 }
 0x955   : > { %s2313_s10 = smov %s1718_s11  ;;  %s2314_s11 = smov %s1816_s18 }
 0x956   : > { %s2315_s12 = smov %s1805_s15  ;;  %21 = sbr.rel (!%p19_p9) target bundleno = 5 (0x5), region = 91 }
 0x95b   :  { %1361 = vsyncpa [#allocation3], 1 }
 0x95c   :  { %1363 = vsyncpa [#allocation3 + $0x1], 1 }

</bundles_post_ra>
